<compile_context>
chip_gen: v6e
topology: v6e:2x2x1
jax: 0.10.0
libtpu: 0.0.40
codegen_flags: <defaults>
</compile_context>

<pallas_src>
import jax
import jax.numpy as jnp
from jax.experimental import pallas as pl
from jax.experimental.pallas import tpu as pltpu


def _mlp_kernel(x_ref, w1_ref, b1_ref, w2_ref, b2_ref, o_ref):
    # Two MXU matmuls (f32 accumulation) + VPU bias/ReLU, all resident in VMEM.
    h = jnp.dot(x_ref[...], w1_ref[...], preferred_element_type=jnp.float32)
    h = jnp.maximum(h + b1_ref[...], 0.0)                 # bias + ReLU (VPU, f32)
    y = jnp.dot(h.astype(w2_ref.dtype), w2_ref[...],
                preferred_element_type=jnp.float32)
    o_ref[...] = (y + b2_ref[...]).astype(o_ref.dtype)


def _nbytes(a):
    return a.size * jnp.dtype(a.dtype).itemsize


def regression_model_forward(x, w1, b1, w2, b2, *,
                             block_b: int = 4096,
                             xla_fallback_max_batch: int = 0):
    """Fused fc2(relu(fc1(x))).

    x: (B, D_in); w1: (D_in, H); b1: (H,); w2: (H, D_out); b2: (D_out,).

    xla_fallback_max_batch: for tiny batches (problem size ~KBs) the custom-call
    launch/DMA setup (~1-2 us) dominates and plain fused XLA is at parity or
    faster; set this > 0 to dispatch such batches to XLA.  Disabled by default
    so the Pallas kernel is always exercised.
    """
    B, D_in = x.shape
    H = w1.shape[1]
    D_out = w2.shape[1]

    if B <= xla_fallback_max_batch:
        return (jnp.maximum(x @ w1 + b1, 0.0) @ w2 + b2).astype(x.dtype)

    # Keep biases 2-D so they map onto (sublane, lane) vregs and broadcast.
    b1_2d = b1.reshape(1, H)
    b2_2d = b2.reshape(1, D_out)

    cost = pl.CostEstimate(
        flops=2 * B * (D_in * H + H * D_out),
        transcendentals=0,
        bytes_accessed=(_nbytes(x) + _nbytes(w1) + _nbytes(b1)
                        + _nbytes(w2) + _nbytes(b2)
                        + B * D_out * jnp.dtype(x.dtype).itemsize),
    )

    out_shape = jax.ShapeDtypeStruct((B, D_out), x.dtype)

    if B <= block_b:
        # ---- small/medium batch: single invocation, no grid, all in VMEM ----
        return pl.pallas_call(
            _mlp_kernel,
            out_shape=out_shape,
            in_specs=[pl.BlockSpec(memory_space=pltpu.MemorySpace.VMEM)] * 5,
            out_specs=pl.BlockSpec(memory_space=pltpu.MemorySpace.VMEM),
            cost_estimate=cost,
        )(x, w1, b1_2d, w2, b2_2d)

    # ---- large batch: tile over B (grid >= 2 by construction), weights kept
    # resident via constant index_maps, B axis "parallel" for v7x megacore.
    # No padding of x or the output: Pallas masks the ragged last block's
    # output writes; garbage rows in the last input block are never stored.
    tb = block_b
    grid = (pl.cdiv(B, tb),)
    return pl.pallas_call(
        _mlp_kernel,
        out_shape=out_shape,
        grid=grid,
        in_specs=[
            pl.BlockSpec((tb, D_in), lambda i: (i, 0)),   # x tile
            pl.BlockSpec((D_in, H), lambda i: (0, 0)),    # W1 resident
            pl.BlockSpec((1, H), lambda i: (0, 0)),       # b1 resident
            pl.BlockSpec((H, D_out), lambda i: (0, 0)),   # W2 resident
            pl.BlockSpec((1, D_out), lambda i: (0, 0)),   # b2 resident
        ],
        out_specs=pl.BlockSpec((tb, D_out), lambda i: (i, 0)),
        compiler_params=pltpu.CompilerParams(
            dimension_semantics=("parallel",)),
        cost_estimate=cost,
    )(x, w1, b1_2d, w2, b2_2d)


if __name__ == "__main__":
    # Shapes implied by the module: input_size=32, complexity=64, output_size=8.
    INPUT_SIZE, COMPLEXITY, OUTPUT_SIZE = 32, 64, 8

    key = jax.random.PRNGKey(0)
    kx, k1, kb1, k2, kb2, kx2 = jax.random.split(key, 6)

    # Deterministic synthetic parameters (not a checkpoint load).
    w1 = jax.random.normal(k1, (INPUT_SIZE, COMPLEXITY), dtype=jnp.float32) * 0.1
    b1 = jax.random.normal(kb1, (COMPLEXITY,), dtype=jnp.float32) * 0.1
    w2 = jax.random.normal(k2, (COMPLEXITY, OUTPUT_SIZE), dtype=jnp.float32) * 0.1
    b2 = jax.random.normal(kb2, (OUTPUT_SIZE,), dtype=jnp.float32) * 0.1

    def ref_fn(xx):
        return jnp.maximum(xx @ w1 + b1, 0.0) @ w2 + b2

    # 1) Small batch -> grid-free path (the shape the module implies).
    B_small = 8
    x_small = jax.random.normal(kx, (B_small, INPUT_SIZE), dtype=jnp.float32)
    out_small = jax.block_until_ready(
        regression_model_forward(x_small, w1, b1, w2, b2))
    assert out_small.shape == (B_small, OUTPUT_SIZE)
    assert jnp.allclose(out_small, ref_fn(x_small), atol=1e-5, rtol=1e-5)

    # 2) Larger batch, B not a multiple of the tile -> B-tiled path with a
    #    ragged last block (unpadded x, unpadded output, resident weights).
    B_big = 300
    x_big = jax.random.normal(kx2, (B_big, INPUT_SIZE), dtype=jnp.float32)
    out_big = jax.block_until_ready(
        regression_model_forward(x_big, w1, b1, w2, b2, block_b=64))
    assert out_big.shape == (B_big, OUTPUT_SIZE)
    assert jnp.allclose(out_big, ref_fn(x_big), atol=1e-5, rtol=1e-5)

    print("KERNEL_OK")
</pallas_src>

<mosaic_0001>
module attributes {stable_mosaic.version = 11 : i64} {
  func.func @_mlp_kernel(%arg0: memref<8x32xf32, #tpu.memory_space<vmem>>, %arg1: memref<32x64xf32, #tpu.memory_space<vmem>>, %arg2: memref<1x64xf32, #tpu.memory_space<vmem>>, %arg3: memref<64x8xf32, #tpu.memory_space<vmem>>, %arg4: memref<1x8xf32, #tpu.memory_space<vmem>>, %arg5: memref<8x8xf32, #tpu.memory_space<vmem>>) attributes {dimension_semantics = [], scalar_prefetch = 0 : i64, scratch_operands = 0 : i64, tpu.core_type = #tpu.core_type<tc>} {
    %c0 = arith.constant 0 : index
    %c0_0 = arith.constant 0 : index
    %0 = vector.load %arg0[%c0, %c0_0] : memref<8x32xf32, #tpu.memory_space<vmem>>, vector<8x32xf32>
    %c0_1 = arith.constant 0 : index
    %c0_2 = arith.constant 0 : index
    %1 = vector.load %arg1[%c0_1, %c0_2] : memref<32x64xf32, #tpu.memory_space<vmem>>, vector<32x64xf32>
    %cst = arith.constant dense<0.000000e+00> : vector<8x64xf32>
    %2 = tpu.matmul %0, %1, %cst {dimension_numbers = #tpu.dot_dimension_numbers<[1], [0], [0], [1], [0, 0, 1, 1], [], []>} : vector<8x32xf32>, vector<32x64xf32>, vector<8x64xf32> -> vector<8x64xf32>
    %c0_3 = arith.constant 0 : index
    %c0_4 = arith.constant 0 : index
    %3 = vector.load %arg2[%c0_3, %c0_4] : memref<1x64xf32, #tpu.memory_space<vmem>>, vector<1x64xf32>
    %4 = vector.broadcast %3 : vector<1x64xf32> to vector<8x64xf32>
    %5 = arith.addf %2, %4 : vector<8x64xf32>
    %cst_5 = arith.constant 0.000000e+00 : f32
    %6 = vector.broadcast %cst_5 : f32 to vector<8x64xf32>
    %7 = arith.maximumf %5, %6 : vector<8x64xf32>
    %c0_6 = arith.constant 0 : index
    %c0_7 = arith.constant 0 : index
    %8 = vector.load %arg3[%c0_6, %c0_7] : memref<64x8xf32, #tpu.memory_space<vmem>>, vector<64x8xf32>
    %cst_8 = arith.constant dense<0.000000e+00> : vector<8x8xf32>
    %9 = tpu.matmul %7, %8, %cst_8 {dimension_numbers = #tpu.dot_dimension_numbers<[1], [0], [0], [1], [0, 0, 1, 1], [], []>} : vector<8x64xf32>, vector<64x8xf32>, vector<8x8xf32> -> vector<8x8xf32>
    %c0_9 = arith.constant 0 : index
    %c0_10 = arith.constant 0 : index
    %10 = vector.load %arg4[%c0_9, %c0_10] : memref<1x8xf32, #tpu.memory_space<vmem>>, vector<1x8xf32>
    %11 = vector.broadcast %10 : vector<1x8xf32> to vector<8x8xf32>
    %12 = arith.addf %9, %11 : vector<8x8xf32>
    %c0_11 = arith.constant 0 : index
    %c0_12 = arith.constant 0 : index
    %13 = vector.load %arg5[%c0_11, %c0_12] : memref<8x8xf32, #tpu.memory_space<vmem>>, vector<8x8xf32>
    tpu.vector_store %arg5[%c0_11, %c0_12], %12 {strides = array<i32>} : memref<8x8xf32, #tpu.memory_space<vmem>>, vector<8x8xf32>,
    return
  }
}

</mosaic_0001>

<bundles_post_ra>
// kernel: tpu_custom_call.1
= control target key start
LH: loop header
LB: loop body
LE: loop exit
PB: predicated region body
PF: predicated region fallthrough
CT: control target
= control target key end

     0   :  { %v286_v1 = vmov 0.0   ;;  %vm287_vm0 = vmmov 0   ;;  %s369_s0 = inlined_call_operand.vmem [shape: f32[8,32], index: 0, kind: input, shape index: {}]   ;;  %s370_s1 = inlined_call_operand.vmem [shape: f32[32,64], index: 1, kind: input, shape index: {}]   ;;  %s371_s2 = inlined_call_operand.vmem [shape: f32[1,64], index: 2, kind: input, shape index: {}]   ;;  %s372_s3 = inlined_call_operand.vmem [shape: f32[64,8], index: 3, kind: input, shape index: {}]   ;;  %s373_s4 = inlined_call_operand.vmem [shape: f32[1,8], index: 4, kind: input, shape index: {}]   ;;  %s374_s5 = inlined_call_operand.hbm [shape: f32[8,8], index: 5, kind: output, shape index: {}]  }
   0x1   :  { %v25_v0 = vld [vmem:[%s370_s1 + $0x18] sm:$0xff]  ;;  %231 = vmatprep.subr.mxu0 %v286_v1  ;;  %v24_v2 = vld [vmem:[%s370_s1 + $0x10] sm:$0xff]  ;;  %239 = vmatprep.mubr.msk.f32.mxu0 %vm287_vm0, %v286_v1  ;;  %v23_v5 = vld [vmem:[%s370_s1 + $0x8] sm:$0xff] }
   0x2   :  { %v115_v3 = vld [vmem:[%s372_s3 + $0x38] sm:$0xff]  ;;  %232 = vmatpush3.msra.mxu0 %v25_v0  ;;  %242 = vmatprep.subr.mxu1 %v286_v1  ;;  %v114_v4 = vld [vmem:[%s372_s3 + $0x30] sm:$0xff] }
   0x3   :  { %233 = vmatprep.subr.mxu0 %v286_v1  ;;  %243 = vmatpush3.msra.mxu1 %v115_v3 }
   0x4   :  { %10 = vsyncpa [#allocation3], 0  ;;  %234 = vmatpush3.msra.mxu0 %v24_v2  ;;  %244 = vmatprep.subr.mxu1 %v286_v1  ;;  %v113_v6 = vld [vmem:[%s372_s3 + $0x28] sm:$0xff]  ;;  %v22_v7 = vld [vmem:[%s370_s1] sm:$0xff]  ;;  %vm33_vm1 = vcmask 261120   ;;  %vm123_vm2 = vcmask 523264  }
   0x5   :  { %235 = vmatprep.subr.mxu0 %v286_v1  ;;  %245 = vmatpush3.msra.mxu1 %v114_v4  ;;  %v21_v8 = vld [vmem:[%s369_s0] sm:$0xff]  ;;  %v111_v10 = vld [vmem:[%s372_s3 + $0x18] sm:$0xff]  ;;  %v110_v11 = vld [vmem:[%s372_s3 + $0x10] sm:$0xff]  ;;  %s288_s21 = smov [#allocation2]   ;;  %vm197_vm3 = vcmask 64512  }
   0x6   :  { %236 = vmatpush3.msra.mxu0 %v23_v5  ;;  %246 = vmatprep.subr.mxu1 %v286_v1  ;;  %v112_v9 = vld [vmem:[%s372_s3 + $0x20] sm:$0xff]  ;;  %v109_v12 = vld [vmem:[%s372_s3 + $0x8] sm:$0xff]  ;;  %s205_s22 = sshll.u32 %s288_s21, 4  ;;  %s206_s22 = int_to_ptr.vmem [resolvable:$true] %s205_s22 }
   0x7   :  { %237 = vmatprep.subr.mxu0 %v286_v1  ;;  %247 = vmatpush3.msra.mxu1 %v113_v6  ;;  %v108_v13 = vld [vmem:[%s372_s3] sm:$0xff]  ;;  %s264_s3 = scalar_lea.vmem %s206_s22, 128  ;;  %p269_p1 = scmp.lt.s32.totalorder %s206_s22, %s206_s22 }
   0x8   :  { %238 = vmatpush3.msra.mxu0 %v22_v7  ;;  %248 = vmatprep.subr.mxu1 %v286_v1  ;;  %v213_v14 = vld [vmem:[%s371_s2] ss:$0 sm:$0xff]  ;;  %p265_p0 = scmp.ne.s32.totalorder %s206_s22, %s264_s3  ;;  %p270_p2 = scmp.lt.s32.totalorder %s264_s3, %s264_s3 }
   0x9   :  { %240 = vmatmul.mubr.msk.f32.vlgmr.msra.gmra.mxu0 %vm33_vm1, %v21_v8  ;;  %249 = vmatpush3.msra.mxu1 %v112_v9  ;;  %v215_v19 = vld [vmem:[%s373_s4] ss:$0 sm:$0xff] }
   0xa   :  { %250 = vmatprep.subr.mxu1 %v286_v1  ;;  %258 = vmatprep.mubr.msk.f32.mxu1 %vm287_vm0, %v286_v1  ;;  %p271_p3 = por %p270_p2, %p269_p1 }
   0xb   :  { %251 = vmatpush3.msra.mxu1 %v111_v10 }
   0xc   :  { %252 = vmatprep.subr.mxu1 %v286_v1  ;;  %p272_p4 = pnand %p271_p3, %p265_p0 }
   0xd   :  { %253 = vmatpush3.msra.mxu1 %v110_v11 }
   0xe   :  { %254 = vmatprep.subr.mxu1 %v286_v1 }
   0xf   :  { %255 = vmatpush3.msra.mxu1 %v109_v12 }
  0x10   :  { %256 = vmatprep.subr.mxu1 %v286_v1 }
  0x11   :  { %257 = vmatpush3.msra.mxu1 %v108_v13 }
  0xc9   :  { %v103_v15 = vpop.f32.mrf.mxu0 }
  0xca   :  { %v104_v16 = vadd.f32 %v213_v14, %v103_v15 }
  0xcb   :  { %v241_v17 = vpop.f32.mrf.mxu0 }
  0xcc   :  { %v107_v18 = vmax.f32 %v104_v16, 0.0 }
  0xce   :  { %259 = vmatmul.mubr.msk.f32.vlgmr.msra.gmra.mxu1 %vm123_vm2, %v107_v18 }
 0x18e   :  { %v193_v20 = vpop.f32.mrf.mxu1 }
 0x18f   :  { %v194_v21 = vadd.f32 %v215_v19, %v193_v20 }
 0x190   :  { %v260_v22 = vpop.f32.mrf.mxu1 }
 0x191   :  { %198 = vst.msk [vmem:[#allocation2] sm:$0xff] %vm197_vm3, %v194_v21 }
 0x192   :  { %275 = shalt.err (!%p272_p4)
}
 0x193   :  { %208 = dma.vmem_to_hbm [thread:$0]  %s206_s22, 128, %s374_s5, [#allocation3]  }
 0x194   :  { %284 = dma.done.wait [#allocation3], 128  }
 0x195   :  { %285 = vsyncadd [#allocation3], 4294967168 }
 0x196   :  { %212 = vsyncpa [#allocation3], 1 }

</bundles_post_ra>
